<compile_context>
chip_gen: v6e
topology: v6e:2x2x1
jax: 0.10.0
libtpu: 0.0.40
codegen_flags: <defaults>
</compile_context>

<pallas_src>
import math
from math import gcd

import numpy as np

import jax
import jax.numpy as jnp
from jax import lax
from jax.experimental import pallas as pl
from jax.experimental.pallas import tpu as pltpu

# ~2 MiB output block => ~4 MiB double-buffered, safe under every generation's
# default scoped-VMEM limit (16 MiB v5e, 32 MiB v6e/v7x) even with block-sized temps.
_TARGET_BLOCK_BYTES = 2 << 20

# Cody-Waite split of 2*pi.  _TWO_PI_HI = 201/32 is exact in f32 with 8 significant
# bits, so k * _TWO_PI_HI is exact for every k reachable with max_len ~ 5000.
_INV_2PI = 0.15915494309189535
_TWO_PI_HI = 6.28125
_TWO_PI_LO = 2.0 * math.pi - 6.28125

# Odd Taylor coefficients of sin on [-pi, pi]; truncation error < 1e-6 at |r| = pi.
_SIN_C3 = -1.0 / 6.0
_SIN_C5 = 1.0 / 120.0
_SIN_C7 = -1.0 / 5040.0
_SIN_C9 = 1.0 / 362880.0
_SIN_C11 = -1.0 / 39916800.0
_SIN_C13 = 1.0 / 6227020800.0
_SIN_C15 = -1.0 / 1307674368000.0


def _sin_bounded(x):
    """sin(x) for non-negative x bounded by ~max_len (<< 2**17), short VPU sequence.

    jnp.sin lowers to a long generic VPU polynomial with full range reduction; the
    table arguments here are non-negative and small, so one Cody-Waite step plus a
    degree-15 odd polynomial is enough and roughly halves the per-element VALU work
    (the binding slot on v6e/v7x).
    """
    k = jnp.floor(x * _INV_2PI + 0.5)          # x >= 0 -> floor(x + 0.5) == round(x)
    r = x - k * _TWO_PI_HI                     # exact (k*HI exact, cancellation exact)
    r = r - k * _TWO_PI_LO                     # |r| <= pi (+ tiny)
    r2 = r * r
    p = _SIN_C15
    p = p * r2 + _SIN_C13
    p = p * r2 + _SIN_C11
    p = p * r2 + _SIN_C9
    p = p * r2 + _SIN_C7
    p = p * r2 + _SIN_C5
    p = p * r2 + _SIN_C3
    return r + r * (r2 * p)


def _rel_pos_enc_kernel(const_ref, o_ref):
    """One (block_rows, LANE) tile of the flattened sinusoid table.

    Element (r, l) of the flat slab corresponds to
        position = r * pos_per_row + (l // d_model)
        dim      = l % d_model
    and equals sin(position * inv_freq[dim//2] + {0 if dim even else pi/2}).
    Both per-lane factors are pre-folded into const_ref rows (scale2, phase2), so
    the kernel is sin(row * scale2 + (base*scale2 + phase2)).
    """
    block_rows, lane = o_ref.shape
    scale2 = const_ref[0:1, :]                             # (1, LANE)
    phase2 = const_ref[1:2, :]                             # (1, LANE)
    base = (pl.program_id(0) * block_rows).astype(jnp.float32)
    off = base * scale2 + phase2                           # (1, LANE), once per block
    # NOTE: int32 iota + convert (float iota is not reliably lowered by Mosaic);
    # the convert is one extra VPU op per vreg.
    row = lax.broadcasted_iota(jnp.int32, (block_rows, lane), 0).astype(jnp.float32)
    o_ref[...] = _sin_bounded(row * scale2 + off)


def _cdiv(a, b):
    return -(-a // b)


def _round_up(a, m):
    return _cdiv(a, m) * m


def rel_positional_encoder(seq_len: int, d_model: int, max_len: int = 5000):
    """Equivalent of RelPositionalEncoder(d_model, max_len).forward(seq_len)."""
    assert 0 < seq_len <= max_len, "requested length exceeds max_len"
    assert d_model % 2 == 0, "d_model must be even (same constraint as PyTorch module)"
    assert max_len < (1 << 24), "positions must stay exactly representable in f32"

    # Lane-dense output width: a multiple of 128 that is also a multiple of d_model.
    if d_model % 128 == 0:
        lane = d_model
    else:
        lane = d_model * 128 // gcd(d_model, 128)          # lcm(d_model, 128)
    pos_per_row = lane // d_model

    # Per-lane constants: computed once on the host in float64, cast to f32, and
    # folded so the kernel needs no per-element posoff / pos_per_row / cos handling.
    lane_idx = np.arange(lane)
    d_idx = lane_idx % d_model
    two_k = (d_idx // 2 * 2).astype(np.float64)
    inv_freq = 1.0 / (10000.0 ** (two_k / float(d_model)))         # inv_freq[dim//2]
    phase = np.where(d_idx % 2 == 0, 0.0, math.pi / 2.0)           # sin vs cos
    posoff = (lane_idx // d_model).astype(np.float64)              # l // d_model
    scale2 = pos_per_row * inv_freq
    phase2 = posoff * inv_freq + phase
    const = jnp.asarray(np.stack([scale2, phase2]).astype(np.float32))   # (2, LANE)

    # Flat-slab row count.  On the lane-packed path the wrapper reshape already pays
    # a relayout pass, so padding rows to a sublane multiple is free and keeps all
    # stores 8-aligned.  On the direct path (pos_per_row == 1) we do NOT pad, to
    # avoid adding a full-table slice copy just to trim a few masked edge rows.
    n_rows = _cdiv(seq_len, pos_per_row)
    if pos_per_row > 1:
        n_rows = _round_up(n_rows, 8)

    bytes_per_row = lane * 4
    max_rows = max(8, (_TARGET_BLOCK_BYTES // bytes_per_row) // 8 * 8)
    if n_rows < 16:
        block_rows = n_rows                 # single block == full array dims (legal)
        grid = (1,)
    else:
        # >= 2 blocks so the writeback of block i-1 overlaps compute of block i;
        # >= 4 blocks when possible so both v7x TensorCores get >= 2 blocks each.
        target_blocks = 4 if n_rows >= 32 else 2
        block_rows = min(max_rows, _round_up(_cdiv(n_rows, target_blocks), 8))
        grid = (_cdiv(n_rows, block_rows),)

    flat = pl.pallas_call(
        _rel_pos_enc_kernel,
        out_shape=jax.ShapeDtypeStruct((n_rows, lane), jnp.float32),
        grid=grid,
        in_specs=[pl.BlockSpec((2, lane), lambda i: (0, 0))],
        out_specs=pl.BlockSpec((block_rows, lane), lambda i: (i, 0)),
        compiler_params=pltpu.CompilerParams(
            dimension_semantics=("parallel",)),
    )(const)

    if pos_per_row == 1:
        return flat                         # already (seq_len, d_model)

    # Row-major reinterpretation back to (positions, d_model).  NOTE: this reshape
    # to a (<128)-lane last dim costs one extra HBM relayout pass; consumers that
    # can take the lane-packed (n_rows, LANE) slab should use `flat` directly.
    out = flat.reshape(n_rows * pos_per_row, d_model)
    if n_rows * pos_per_row != seq_len:
        out = out[:seq_len, :]
    return out


def _reference_f32(seq_len: int, d_model: int):
    """Pure-JAX f32 reference mirroring the PyTorch __init__ + forward."""
    pos = jnp.arange(seq_len, dtype=jnp.float32)
    inv_freq = 1.0 / (10000.0 ** (jnp.arange(0.0, d_model, 2.0) / d_model))
    enc = jnp.zeros((seq_len, d_model), jnp.float32)
    enc = enc.at[:, 0::2].set(jnp.sin(pos[:, None] * inv_freq[None, :]))
    enc = enc.at[:, 1::2].set(jnp.cos(pos[:, None] * inv_freq[None, :]))
    return enc


def _reference_f64(seq_len: int, d_model: int):
    """Host float64 reference (ground truth for larger positions)."""
    pos = np.arange(seq_len, dtype=np.float64)
    inv_freq = 1.0 / (10000.0 ** (np.arange(0.0, d_model, 2.0) / d_model))
    enc = np.zeros((seq_len, d_model), np.float64)
    enc[:, 0::2] = np.sin(pos[:, None] * inv_freq[None, :])
    enc[:, 1::2] = np.cos(pos[:, None] * inv_freq[None, :])
    return enc


if __name__ == "__main__":
    # The module has no learned parameters and forward takes an int length;
    # the key is only for harness determinism conventions.
    _ = jax.random.PRNGKey(0)

    # 1) Small shape consistent with the module's forward (lane-packed path,
    #    d_model=32 -> LANE=128, 4 positions per lane-row, single block).
    seq_len, d_model = 8, 32
    out = jax.block_until_ready(rel_positional_encoder(seq_len, d_model, 5000))
    ref = _reference_f32(seq_len, d_model)
    assert out.shape == (seq_len, d_model) and out.dtype == jnp.float32
    assert float(jnp.max(jnp.abs(out - ref))) < 1e-5

    # 2) Multi-block grid (4 "parallel" blocks, ragged edge), d_model multiple of
    #    128 (direct lane layout).  Compared against the f64 ground truth with a
    #    tolerance covering inherent f32 argument rounding at positions up to ~1500.
    out2 = jax.block_until_ready(rel_positional_encoder(1500, 512))
    ref2 = _reference_f64(1500, 512)
    assert out2.shape == (1500, 512)
    assert float(np.max(np.abs(np.asarray(out2, np.float64) - ref2))) < 2e-3

    # 3) d_model that neither divides nor is divisible by 128 -> lcm lane packing
    #    with rows padded to a sublane multiple.
    out3 = jax.block_until_ready(rel_positional_encoder(40, 48))
    ref3 = _reference_f32(40, 48)
    assert out3.shape == (40, 48)
    assert float(jnp.max(jnp.abs(out3 - ref3))) < 5e-5

    # 4) Full default table range: validates the bounded-domain sin's range
    #    reduction out to ~5000 rad.  Tolerance covers the inherent f32 argument
    #    rounding (~pos * 2^-22) that the float32 PyTorch table shares.
    out4 = jax.block_until_ready(rel_positional_encoder(5000, 128))
    ref4 = _reference_f64(5000, 128)
    assert out4.shape == (5000, 128)
    assert float(np.max(np.abs(np.asarray(out4, np.float64) - ref4))) < 2.5e-3

    print("KERNEL_OK")
</pallas_src>

<mosaic_0001>
module attributes {stable_mosaic.version = 11 : i64} {
  func.func @_rel_pos_enc_kernel(%arg0: i32, %arg1: memref<2x128xf32, #tpu.memory_space<vmem>>, %arg2: memref<8x128xf32, #tpu.memory_space<vmem>>) attributes {dimension_semantics = [#tpu.dimension_semantics<parallel>], iteration_bounds = array<i64: 1>, scalar_prefetch = 0 : i64, scratch_operands = 0 : i64, tpu.core_type = #tpu.core_type<tc>, window_params = [{pipeline_mode = #tpu.pipeline_mode<synchronous>, transform_indices = @transform_0, window_bounds = array<i64: 2, 128>}, {transform_indices = @transform_1, window_bounds = array<i64: 8, 128>}]} {
    %c0 = arith.constant 0 : index
    %c0_0 = arith.constant 0 : index
    %0 = vector.load %arg1[%c0, %c0_0] : memref<2x128xf32, #tpu.memory_space<vmem>>, vector<1x128xf32>
    %c1 = arith.constant 1 : index
    %c0_1 = arith.constant 0 : index
    %1 = vector.load %arg1[%c1, %c0_1] : memref<2x128xf32, #tpu.memory_space<vmem>>, vector<1x128xf32>
    %c8_i32 = arith.constant 8 : i32
    %2 = arith.muli %arg0, %c8_i32 : i32
    %3 = arith.sitofp %2 : i32 to f32
    %4 = vector.broadcast %3 : f32 to vector<1x128xf32>
    %5 = arith.mulf %4, %0 : vector<1x128xf32>
    %6 = arith.addf %5, %1 : vector<1x128xf32>
    %7 = tpu.iota {dimensions = array<i32: 0>} : vector<8x128xi32>
    %8 = arith.sitofp %7 : vector<8x128xi32> to vector<8x128xf32>
    %9 = vector.broadcast %0 : vector<1x128xf32> to vector<8x128xf32>
    %10 = arith.mulf %8, %9 : vector<8x128xf32>
    %11 = vector.broadcast %6 : vector<1x128xf32> to vector<8x128xf32>
    %12 = arith.addf %10, %11 : vector<8x128xf32>
    %cst = arith.constant 0.159154937 : f32
    %13 = vector.broadcast %cst : f32 to vector<8x128xf32>
    %14 = arith.mulf %12, %13 : vector<8x128xf32>
    %cst_2 = arith.constant 5.000000e-01 : f32
    %15 = vector.broadcast %cst_2 : f32 to vector<8x128xf32>
    %16 = arith.addf %14, %15 : vector<8x128xf32>
    %17 = math.floor %16 : vector<8x128xf32>
    %cst_3 = arith.constant 6.281250e+00 : f32
    %18 = vector.broadcast %cst_3 : f32 to vector<8x128xf32>
    %19 = arith.mulf %17, %18 : vector<8x128xf32>
    %20 = arith.subf %12, %19 : vector<8x128xf32>
    %cst_4 = arith.constant 0.00193530717 : f32
    %21 = vector.broadcast %cst_4 : f32 to vector<8x128xf32>
    %22 = arith.mulf %17, %21 : vector<8x128xf32>
    %23 = arith.subf %20, %22 : vector<8x128xf32>
    %24 = arith.mulf %23, %23 : vector<8x128xf32>
    %cst_5 = arith.constant -7.6471636E-13 : f32
    %25 = vector.broadcast %cst_5 : f32 to vector<8x128xf32>
    %26 = arith.mulf %25, %24 : vector<8x128xf32>
    %cst_6 = arith.constant 1.60590444E-10 : f32
    %27 = vector.broadcast %cst_6 : f32 to vector<8x128xf32>
    %28 = arith.addf %26, %27 : vector<8x128xf32>
    %29 = arith.mulf %28, %24 : vector<8x128xf32>
    %cst_7 = arith.constant -2.50521079E-8 : f32
    %30 = vector.broadcast %cst_7 : f32 to vector<8x128xf32>
    %31 = arith.addf %29, %30 : vector<8x128xf32>
    %32 = arith.mulf %31, %24 : vector<8x128xf32>
    %cst_8 = arith.constant 2.75573188E-6 : f32
    %33 = vector.broadcast %cst_8 : f32 to vector<8x128xf32>
    %34 = arith.addf %32, %33 : vector<8x128xf32>
    %35 = arith.mulf %34, %24 : vector<8x128xf32>
    %cst_9 = arith.constant -1.98412701E-4 : f32
    %36 = vector.broadcast %cst_9 : f32 to vector<8x128xf32>
    %37 = arith.addf %35, %36 : vector<8x128xf32>
    %38 = arith.mulf %37, %24 : vector<8x128xf32>
    %cst_10 = arith.constant 0.00833333377 : f32
    %39 = vector.broadcast %cst_10 : f32 to vector<8x128xf32>
    %40 = arith.addf %38, %39 : vector<8x128xf32>
    %41 = arith.mulf %40, %24 : vector<8x128xf32>
    %cst_11 = arith.constant -0.166666672 : f32
    %42 = vector.broadcast %cst_11 : f32 to vector<8x128xf32>
    %43 = arith.addf %41, %42 : vector<8x128xf32>
    %44 = arith.mulf %24, %43 : vector<8x128xf32>
    %45 = arith.mulf %23, %44 : vector<8x128xf32>
    %46 = arith.addf %23, %45 : vector<8x128xf32>
    %c0_12 = arith.constant 0 : index
    %c0_13 = arith.constant 0 : index
    %47 = vector.load %arg2[%c0_12, %c0_13] : memref<8x128xf32, #tpu.memory_space<vmem>>, vector<8x128xf32>
    tpu.vector_store %arg2[%c0_12, %c0_13], %46 {strides = array<i32>} : memref<8x128xf32, #tpu.memory_space<vmem>>, vector<8x128xf32>,
    return
  }
  func.func @transform_0(%arg0: i32) -> (i32, i32) {
    %c0_i32 = arith.constant 0 : i32
    %c0_i32_0 = arith.constant 0 : i32
    %c0_i32_1 = arith.constant 0 : i32
    return %c0_i32, %c0_i32_0 : i32, i32
  }
  func.func @transform_1(%arg0: i32) -> (i32, i32) {
    %c0_i32 = arith.constant 0 : i32
    %c0_i32_0 = arith.constant 0 : i32
    return %arg0, %c0_i32 : i32, i32
  }
}

</mosaic_0001>

<bundles_post_ra>
// kernel: tpu_custom_call.1
= control target key start
LH: loop header
LB: loop body
LE: loop exit
PB: predicated region body
PF: predicated region fallthrough
CT: control target
= control target key end

     0   :  { %6 = vsyncpa [#allocation3], 0  ;;  %s144_s0 = inlined_call_operand.hbm [shape: f32[2,128], index: 0, kind: input, shape index: {}]   ;;  %s145_s1 = inlined_call_operand.hbm [shape: f32[8,128], index: 1, kind: output, shape index: {}]  }
   0x1   :  { %7 = vsyncpa [#allocation4], 0  ;;  %s126_s6 = smov [#allocation2]  }
   0x2   :  { %s14_s7 = sshll.u32 %s126_s6, 4  ;;  %s15_s7 = int_to_ptr.vmem [resolvable:$true] %s14_s7 }
   0x3   :  { %s90_s8 = scalar_lea.vmem %s15_s7, 32  ;;  %p95_p1 = scmp.lt.s32.totalorder %s15_s7, %s15_s7 }
   0x4   :  { %p91_p0 = scmp.ne.s32.totalorder %s15_s7, %s90_s8  ;;  %p96_p2 = scmp.lt.s32.totalorder %s90_s8, %s90_s8 }
   0x6   :  { %p97_p3 = por %p96_p2, %p95_p1 }
   0x8   :  { %p98_p4 = pnand %p97_p3, %p91_p0 }
   0xa   :  { %101 = shalt.err (!%p98_p4)
}
   0xb   :  { %17 = dma.hbm_to_vmem [thread:$0]  %s144_s0, 32, %s15_s7, [#allocation3]  }
   0xc   :  { %122 = dma.done.wait [#allocation3], 32  }
   0xd   :  { %123 = vsyncadd [#allocation3], 4294967264  ;;  %v28_v0 = vlaneseq  ;;  %v21_v4 = vld [vmem:[#allocation2] sm:$0x1]  ;;  %v22_v5 = vld [vmem:[#allocation2 + $0x1] sm:$0x1] }
   0xe   :  { %v26_v6 = vmul.f32 0.0, %v21_v4  ;;  %s127_s0 = smov [#allocation5]  }
   0xf   :  { %v29_v1 = vshrl.u32 %v28_v0, 7  ;;  %s71_s11 = sshll.u32 %s127_s0, 4  ;;  %s72_s11 = int_to_ptr.vmem [resolvable:$true] %s71_s11 }
  0x10   :  { %v27_v8 = vadd.f32 %v26_v6, %v22_v5  ;;  %s102_s12 = scalar_lea.vmem %s72_s11, 128  ;;  %p107_p6 = scmp.lt.s32.totalorder %s72_s11, %s72_s11 }
  0x11   :  { %v33_v2 = vsub.s32 0, %v29_v1  ;;  %v30_v3 = vcvt.s32.f32 %v29_v1  ;;  %p103_p5 = scmp.ne.s32.totalorder %s72_s11, %s102_s12  ;;  %p108_p7 = scmp.lt.s32.totalorder %s102_s12, %s102_s12 }
  0x13   :  { %v34_v7 = vrot.slane %v21_v4, %v33_v2  ;;  %v39_v10 = vrot.slane %v27_v8, %v33_v2  ;;  %p109_p8 = por %p108_p7, %p107_p6 }
  0x15   :  { %v35_v9 = vmul.f32 %v34_v7, %v30_v3  ;;  %p110_p9 = pnand %p109_p8, %p103_p5 }
  0x17   :  { %v40_v11 = vadd.f32 %v39_v10, %v35_v9 }
  0x19   :  { %v41_v12 = vmul.f32 0.15915494, %v40_v11 }
  0x1b   :  { %v42_v13 = vadd.f32 0.5, %v41_v12 }
  0x1d   :  { %v43_v14 = vfloor.f32 %v42_v13 }
  0x1f   :  { %v44_v15 = vmul.f32 6.28125, %v43_v14  ;;  %v46_v16 = vmul.f32 0.0019353072, %v43_v14 }
  0x21   :  { %v45_v17 = vsub.f32 %v40_v11, %v44_v15 }
  0x23   :  { %v47_v18 = vsub.f32 %v45_v17, %v46_v16 }
  0x25   :  { %v48_v19 = vmul.f32 %v47_v18, %v47_v18 }
  0x27   :  { %v49_v20 = vmul.f32 -7.6471636e-13, %v48_v19 }
  0x29   :  { %v50_v21 = vadd.f32 1.6059044e-10, %v49_v20 }
  0x2b   :  { %v51_v22 = vmul.f32 %v50_v21, %v48_v19 }
  0x2d   :  { %v52_v23 = vadd.f32 -2.5052108e-08, %v51_v22 }
  0x2f   :  { %v53_v24 = vmul.f32 %v52_v23, %v48_v19 }
  0x31   :  { %v54_v25 = vadd.f32 2.7557319e-06, %v53_v24 }
  0x33   :  { %v55_v26 = vmul.f32 %v54_v25, %v48_v19 }
  0x35   :  { %v56_v27 = vadd.f32 -0.0001984127, %v55_v26 }
  0x37   :  { %v57_v28 = vmul.f32 %v56_v27, %v48_v19 }
  0x39   :  { %v58_v29 = vadd.f32 0.008333334, %v57_v28 }
  0x3b   :  { %v59_v30 = vmul.f32 %v58_v29, %v48_v19 }
  0x3d   :  { %v60_v31 = vadd.f32 -0.16666667, %v59_v30 }
  0x3f   :  { %v61_v32 = vmul.f32 %v60_v31, %v48_v19 }
  0x41   :  { %v62_v33 = vmul.f32 %v61_v32, %v47_v18 }
  0x43   :  { %v63_v34 = vadd.f32 %v62_v33, %v47_v18 }
  0x45   :  { %64 = vst [vmem:[#allocation5] sm:$0xff] %v63_v34 }
  0x46   :  { %113 = shalt.err (!%p110_p9)
}
  0x47   :  { %74 = dma.vmem_to_hbm [thread:$0]  %s72_s11, 128, %s145_s1, [#allocation4]  }
  0x48   :  { %124 = dma.done.wait [#allocation4], 128  }
  0x49   :  { %125 = vsyncadd [#allocation4], 4294967168 }
  0x4a   :  { %78 = vsyncpa [#allocation3], 1 }
  0x4b   :  { %79 = vsyncpa [#allocation4], 1 }

</bundles_post_ra>
